<compile_context>
chip_gen: v5e
topology: v5e:2x2
jax: 0.10.0
libtpu: 0.0.40
codegen_flags: <defaults>
</compile_context>

<pallas_src>
import jax
import jax.numpy as jnp
from jax.experimental import pallas as pl
from jax.experimental.pallas import tpu as pltpu

STATE_DIM = 4    # CartPole-v0 observation dim
ACTION_DIM = 2   # CartPole-v0 action dim
HIDDEN = 50


def dqn_kernel(x_ref, w1_ref, b1_ref, w2_ref, b2_ref, q_ref, a_ref):
    """q = relu(x @ W1 + b1) @ W2 + b2 ;  a = greedy action (argmax of 2 cols).

    Weights arrive already in [in, out] layout and biases as [1, out] rows, so
    the kernel is two straight MXU matmuls plus VPU bias-add/ReLU — no in-kernel
    transposes, and the whole problem lives in a couple of vregs.
    """
    h = jnp.dot(x_ref[...], w1_ref[...], preferred_element_type=jnp.float32)
    h = jnp.maximum(h + b1_ref[...], 0.0)
    q = jnp.dot(h, w2_ref[...], preferred_element_type=jnp.float32) + b2_ref[...]
    q_ref[...] = q.astype(q_ref.dtype)
    # Fused greedy-action selection (ACTION_DIM == 2). Ties resolve to action 0,
    # matching jnp.argmax / torch.argmax tie-breaking.
    a_ref[...] = (q[:, 1:2] > q[:, 0:1]).astype(jnp.int32)


@jax.jit
def dqn_forward(x, w1_t, b1_row, w2_t, b2_row):
    """x: [B, STATE_DIM] f32.

    Parameters are in kernel-native layout (converted once at init time):
        w1_t: [STATE_DIM, HIDDEN]   b1_row: [1, HIDDEN]
        w2_t: [HIDDEN, ACTION_DIM]  b2_row: [1, ACTION_DIM]
    Returns (q_values [B, ACTION_DIM] f32, greedy_action [B, 1] int32).
    """
    B = x.shape[0]
    vmem = pl.BlockSpec(memory_space=pltpu.MemorySpace.VMEM)

    flops = 2 * B * (STATE_DIM * HIDDEN + HIDDEN * ACTION_DIM)
    bytes_accessed = 4 * (
        B * STATE_DIM                        # x
        + STATE_DIM * HIDDEN + HIDDEN        # fc1 params
        + HIDDEN * ACTION_DIM + ACTION_DIM   # fc2 params
        + B * ACTION_DIM                     # q output
        + B                                  # action output
    )

    return pl.pallas_call(
        dqn_kernel,
        out_shape=(
            jax.ShapeDtypeStruct((B, ACTION_DIM), jnp.float32),
            jax.ShapeDtypeStruct((B, 1), jnp.int32),
        ),
        in_specs=[vmem, vmem, vmem, vmem, vmem],
        out_specs=(vmem, vmem),
        cost_estimate=pl.CostEstimate(
            flops=flops, transcendentals=0, bytes_accessed=bytes_accessed),
    )(x, w1_t, b1_row, w2_t, b2_row)


def init_params(key):
    """Mirror the PyTorch module init (weights ~ N(0, 0.1) via init_weights,
    biases ~ U(-1/sqrt(fan_in), +1/sqrt(fan_in)) — nn.Linear default), then
    convert ONCE to kernel-native layout ([in, out] weights, [1, out] bias
    rows) so the per-call hot path never transposes or reshapes."""
    k1, k2, k3, k4 = jax.random.split(key, 4)
    # PyTorch layout [out, in] first (faithful to the module), then transpose once.
    w1 = 0.1 * jax.random.normal(k1, (HIDDEN, STATE_DIM), jnp.float32)
    w2 = 0.1 * jax.random.normal(k2, (ACTION_DIM, HIDDEN), jnp.float32)
    bound1 = 1.0 / jnp.sqrt(jnp.float32(STATE_DIM))
    bound2 = 1.0 / jnp.sqrt(jnp.float32(HIDDEN))
    b1 = jax.random.uniform(k3, (HIDDEN,), jnp.float32, -bound1, bound1)
    b2 = jax.random.uniform(k4, (ACTION_DIM,), jnp.float32, -bound2, bound2)

    w1_t = jnp.transpose(w1)                 # [STATE_DIM, HIDDEN]   (one-time)
    w2_t = jnp.transpose(w2)                 # [HIDDEN, ACTION_DIM]  (one-time)
    b1_row = b1.reshape(1, HIDDEN)           # (one-time)
    b2_row = b2.reshape(1, ACTION_DIM)       # (one-time)
    return w1_t, b1_row, w2_t, b2_row


if __name__ == "__main__":
    key = jax.random.PRNGKey(0)
    k_x, k_p = jax.random.split(key)

    B = 8  # multiple of 8 (f32 sublane count) -> no masked sublane ops
    x = jax.random.normal(k_x, (B, STATE_DIM), jnp.float32)
    w1_t, b1_row, w2_t, b2_row = init_params(k_p)

    q, act = dqn_forward(x, w1_t, b1_row, w2_t, b2_row)
    q = jax.block_until_ready(q)
    act = jax.block_until_ready(act)

    # sanity check against plain-JAX reference (same math as the PyTorch forward)
    ref_q = jnp.maximum(x @ w1_t + b1_row, 0.0) @ w2_t + b2_row
    ref_a = jnp.argmax(ref_q, axis=-1).astype(jnp.int32)[:, None]

    assert q.shape == (B, ACTION_DIM) and act.shape == (B, 1)
    assert jnp.allclose(q, ref_q, atol=1e-5, rtol=1e-5)
    assert jnp.array_equal(act, ref_a)

    # TODO(synk): if used for DQN training, fuse online + target nets (and the
    # TD-target max) into one pallas_call to halve launch/DMA overhead.
    print("KERNEL_OK")
</pallas_src>

<mosaic_0001>
module attributes {stable_mosaic.version = 11 : i64} {
  func.func @dqn_kernel(%arg0: memref<8x4xf32, #tpu.memory_space<vmem>>, %arg1: memref<4x50xf32, #tpu.memory_space<vmem>>, %arg2: memref<1x50xf32, #tpu.memory_space<vmem>>, %arg3: memref<50x2xf32, #tpu.memory_space<vmem>>, %arg4: memref<1x2xf32, #tpu.memory_space<vmem>>, %arg5: memref<8x2xf32, #tpu.memory_space<vmem>>, %arg6: memref<8x1xi32, #tpu.memory_space<vmem>>) attributes {dimension_semantics = [], scalar_prefetch = 0 : i64, scratch_operands = 0 : i64, tpu.core_type = #tpu.core_type<tc>} {
    %c0 = arith.constant 0 : index
    %c0_0 = arith.constant 0 : index
    %0 = vector.load %arg0[%c0, %c0_0] : memref<8x4xf32, #tpu.memory_space<vmem>>, vector<8x4xf32>
    %c0_1 = arith.constant 0 : index
    %c0_2 = arith.constant 0 : index
    %1 = vector.load %arg1[%c0_1, %c0_2] : memref<4x50xf32, #tpu.memory_space<vmem>>, vector<4x50xf32>
    %cst = arith.constant dense<0.000000e+00> : vector<8x50xf32>
    %2 = tpu.matmul %0, %1, %cst {dimension_numbers = #tpu.dot_dimension_numbers<[1], [0], [0], [1], [0, 0, 1, 1], [], []>} : vector<8x4xf32>, vector<4x50xf32>, vector<8x50xf32> -> vector<8x50xf32>
    %c0_3 = arith.constant 0 : index
    %c0_4 = arith.constant 0 : index
    %3 = vector.load %arg2[%c0_3, %c0_4] : memref<1x50xf32, #tpu.memory_space<vmem>>, vector<1x50xf32>
    %4 = vector.broadcast %3 : vector<1x50xf32> to vector<8x50xf32>
    %5 = arith.addf %2, %4 : vector<8x50xf32>
    %cst_5 = arith.constant 0.000000e+00 : f32
    %6 = vector.broadcast %cst_5 : f32 to vector<8x50xf32>
    %7 = arith.maximumf %5, %6 : vector<8x50xf32>
    %c0_6 = arith.constant 0 : index
    %c0_7 = arith.constant 0 : index
    %8 = vector.load %arg3[%c0_6, %c0_7] : memref<50x2xf32, #tpu.memory_space<vmem>>, vector<50x2xf32>
    %cst_8 = arith.constant dense<0.000000e+00> : vector<8x2xf32>
    %9 = tpu.matmul %7, %8, %cst_8 {dimension_numbers = #tpu.dot_dimension_numbers<[1], [0], [0], [1], [0, 0, 1, 1], [], []>} : vector<8x50xf32>, vector<50x2xf32>, vector<8x2xf32> -> vector<8x2xf32>
    %c0_9 = arith.constant 0 : index
    %c0_10 = arith.constant 0 : index
    %10 = vector.load %arg4[%c0_9, %c0_10] : memref<1x2xf32, #tpu.memory_space<vmem>>, vector<1x2xf32>
    %11 = vector.broadcast %10 : vector<1x2xf32> to vector<8x2xf32>
    %12 = arith.addf %9, %11 : vector<8x2xf32>
    %c0_11 = arith.constant 0 : index
    %c0_12 = arith.constant 0 : index
    %13 = vector.load %arg5[%c0_11, %c0_12] : memref<8x2xf32, #tpu.memory_space<vmem>>, vector<8x2xf32>
    tpu.vector_store %arg5[%c0_11, %c0_12], %12 {strides = array<i32>} : memref<8x2xf32, #tpu.memory_space<vmem>>, vector<8x2xf32>,
    %14 = vector.extract_strided_slice %12 {offsets = [0, 1], sizes = [8, 1], strides = [1, 1]} : vector<8x2xf32> to vector<8x1xf32>
    %15 = vector.extract_strided_slice %12 {offsets = [0, 0], sizes = [8, 1], strides = [1, 1]} : vector<8x2xf32> to vector<8x1xf32>
    %16 = arith.cmpf ogt, %14, %15 : vector<8x1xf32>
    %17 = arith.extui %16 : vector<8x1xi1> to vector<8x1xi32>
    %c0_13 = arith.constant 0 : index
    %c0_14 = arith.constant 0 : index
    %18 = vector.load %arg6[%c0_13, %c0_14] : memref<8x1xi32, #tpu.memory_space<vmem>>, vector<8x1xi32>
    tpu.vector_store %arg6[%c0_13, %c0_14], %17 {strides = array<i32>} : memref<8x1xi32, #tpu.memory_space<vmem>>, vector<8x1xi32>,
    return
  }
}

</mosaic_0001>

<bundles_post_ra>
// kernel: dqn_forward.1
= control target key start
LH: loop header
LB: loop body
LE: loop exit
PB: predicated region body
PF: predicated region fallthrough
CT: control target
= control target key end

     0   :  { %vm32_vm0 = vcmask 1043456   ;;  %vm28_vm1 = vcmask 31744   ;;  %vm72_vm2 = vcmask 1041408   ;;  %vm68_vm3 = vcmask 408576   ;;  %s202_s1 = inlined_call_operand.vmem [shape: f32[4,50], index: 1, kind: input, shape index: {}]   ;;  %s203_s0 = inlined_call_operand.vmem [shape: f32[8,4], index: 0, kind: input, shape index: {}]   ;;  %s204_s3 = inlined_call_operand.vmem [shape: f32[50,2], index: 3, kind: input, shape index: {}]   ;;  %s205_s2 = inlined_call_operand.vmem [shape: f32[1,50], index: 2, kind: input, shape index: {}]   ;;  %s206_s4 = inlined_call_operand.vmem [shape: f32[1,2], index: 4, kind: input, shape index: {}]   ;;  %s207_s5 = inlined_call_operand.vmem [shape: f32[8,2], index: 5, kind: output, shape index: {0}]   ;;  %s208_s6 = inlined_call_operand.vmem [shape: s32[8,1], index: 6, kind: output, shape index: {1}]  }
   0x1   :  { %v23_v0 = vld [vmem:[%s202_s1] sm:$0xf]  ;;  %v63_v2 = vld [vmem:[%s204_s3 + $0x30] sm:$0x3]  ;;  %v62_v3 = vld [vmem:[%s204_s3 + $0x28] sm:$0xff]  ;;  %vm96_vm4 = vcmask 15360  }
   0x2   :  { %v22_v1 = vld [vmem:[%s203_s0] sm:$0xff]  ;;  %116 = vmatpush.msk.msra.mxu0 %vm32_vm0, %v23_v0  ;;  %118 = vmatpush.msk.msra.mxu1 %vm72_vm2, %v63_v2  ;;  %v60_v5 = vld [vmem:[%s204_s3 + $0x18] sm:$0xff]  ;;  %v59_v6 = vld [vmem:[%s204_s3 + $0x10] sm:$0xff]  ;;  %v126_v17 = vmov 0   ;;  %vm106_vm6 = vcmask 7168  }
   0x3   :  { %117 = vmatmul.msk.f32.vlgmr.msra.gmra.mxu0 %vm28_vm1, %v22_v1  ;;  %v61_v4 = vld [vmem:[%s204_s3 + $0x20] sm:$0xff]  ;;  %v58_v7 = vld [vmem:[%s204_s3 + $0x8] sm:$0xff] }
   0x4   :  { %86 = vmatpush.msra.mxu1 %v62_v3  ;;  %v57_v8 = vld [vmem:[%s204_s3] sm:$0xff]  ;;  %s125_s3 = smov 1  }
   0x5   :  { %v123_v9 = vld [vmem:[%s205_s2] ss:$0 sm:$0xff]  ;;  %s127_s2 = smov 127  }
   0x6   :  { %87 = vmatpush.msra.mxu1 %v61_v4  ;;  %v124_v13 = vld [vmem:[%s206_s4] ss:$0 sm:$0xff] }
   0x8   :  { %88 = vmatpush.msra.mxu1 %v60_v5 }
   0xa   :  { %89 = vmatpush.msra.mxu1 %v59_v6 }
   0xc   :  { %90 = vmatpush.msra.mxu1 %v58_v7 }
   0xe   :  { %91 = vmatpush.msra.mxu1 %v57_v8 }
  0x80   :  { %v53_v10 = vpop.f32.mrf.mxu0 }
  0x81   :  { %v54_v11 = vadd.f32 %v123_v9, %v53_v10 }
  0x83   :  { %v56_v12 = vmax.f32 %v54_v11, 0.0 }
  0x85   :  { %119 = vmatmul.msk.f32.vlgmr.msra.gmra.mxu1 %vm68_vm3, %v56_v12 }
 0x102   :  { %v93_v14 = vpop.f32.mrf.mxu1 }
 0x103   :  { %v94_v15 = vadd.f32 %v124_v13, %v93_v14 }
 0x105   :  { %97 = vst.msk [vmem:[%s207_s5] sm:$0xff] %vm96_vm4, %v94_v15  ;;  %99 = vrot.lane.b32.xlu0 %v94_v15, %s125_s3 }
 0x177   :  { %v100_v16 = vpop.permute.xlu0 %99 }
 0x178   :  { %vm102_vm5 = vcmp.gt.f32.partialorder %v94_v15, %v100_v16 }
 0x179   :  { %v103_v18 = vsel %vm102_vm5, 1, %v126_v17 }
 0x17a   :  { %104 = vrot.lane.b32.xlu0 %v103_v18, %s127_s2 }
 0x1ec   :  { %v105_v19 = vpop.permute.xlu0 %104 }
 0x1ed   :  { %107 = vst.msk [vmem:[%s208_s6] sm:$0xff] %vm106_vm6, %v105_v19 }

</bundles_post_ra>
